<compile_context>
chip_gen: v7x
topology: tpu7x:2x2x1
jax: 0.10.0
libtpu: 0.0.40
codegen_flags: <defaults>
</compile_context>

<pallas_src>
import functools
import math

import jax
import jax.numpy as jnp
from jax import lax
from jax.experimental import pallas as pl
from jax.experimental.pallas import tpu as pltpu


def _feature_map(x):
    # elu(x) + 1 == x + 1 (x > 0) else exp(x); computed in f32.
    return jnp.where(x > 0, x + 1.0, jnp.exp(x))


def _ktv_kernel(mask_ref, k_ref, v_ref, ktv_ref, acc_ref, *, scale, dot_dtype):
    s = pl.program_id(2)

    @pl.when(s == 0)
    def _():
        acc_ref[...] = jnp.zeros_like(acc_ref)

    k = k_ref[...].astype(jnp.float32)        # (tS, D)
    m = mask_ref[...].astype(jnp.float32)     # (tS, 1)
    # (m*K)^T (m*V) == (m^2*K)^T V : apply the squared mask to K only.
    kf = (_feature_map(k) * (m * m)).astype(dot_dtype)
    v = v_ref[...].astype(dot_dtype)          # (tS, D)

    # Contract over the sequence axis directly (no kf.T materialization).
    acc_ref[...] += lax.dot_general(
        kf, v,
        dimension_numbers=(((0,), (0,)), ((), ())),
        preferred_element_type=jnp.float32)

    @pl.when(s == pl.num_programs(2) - 1)
    def _():
        # Fold both S^-1/4 scales into the tiny (D, D) tile.
        ktv_ref[...] = (acc_ref[...] * scale).astype(ktv_ref.dtype)


def _out_kernel(q_ref, ktv_ref, o_ref, *, dot_dtype):
    q = q_ref[...].astype(jnp.float32)        # (tS, D)
    qf = _feature_map(q).astype(dot_dtype)    # scale already folded into ktv
    ktv = ktv_ref[...].astype(dot_dtype)      # (D, D)
    o_ref[...] = jnp.dot(qf, ktv,
                         preferred_element_type=jnp.float32).astype(o_ref.dtype)


def _choose_tile(s):
    """Largest convenient S-tile that divides s (bounded so VMEM stays small)."""
    if s <= 1024:
        return s
    for t in (512, 256, 128, 64, 32, 16, 8):
        if s % t == 0:
            return t
    return s  # fallback: full length (still legal, just larger blocks)


def linear_attention(Q, K, V, mask):
    B, H, Sq, D = Q.shape
    _, _, Skv, _ = K.shape
    assert V.shape == K.shape and mask.shape == (B, Skv)

    dot_dtype = jnp.bfloat16 if Q.dtype == jnp.bfloat16 else jnp.float32
    # Combined 1/(Sq^0.25 * Skv^0.25) scale, applied once to the (D, D) tile.
    scale = 1.0 / (math.sqrt(math.sqrt(Sq)) * math.sqrt(math.sqrt(Skv)))

    # Keep the mask in f32 (no bf16 quantization); (tS, 1) column per tile.
    mask_col = mask.astype(jnp.float32).reshape(B, Skv, 1)

    itemsize = jnp.dtype(Q.dtype).itemsize
    vmem_limit = 32 * 1024 * 1024

    # ---------------- Stage 1: ktv[b, h] = scale * (phi(K) m^2)^T V ----------
    tkv = _choose_tile(Skv)
    n_kv = Skv // tkv

    kv_spec = pl.BlockSpec((None, None, tkv, D), lambda b, h, s: (b, h, s, 0))
    mask_spec = pl.BlockSpec((None, tkv, 1), lambda b, h, s: (b, s, 0))
    ktv_out_spec = pl.BlockSpec((None, None, D, D), lambda b, h, s: (b, h, 0, 0))

    ktv = pl.pallas_call(
        functools.partial(_ktv_kernel, scale=scale, dot_dtype=dot_dtype),
        out_shape=jax.ShapeDtypeStruct((B, H, D, D), jnp.float32),
        grid_spec=pltpu.PrefetchScalarGridSpec(
            num_scalar_prefetch=0,
            grid=(B, H, n_kv),
            in_specs=[mask_spec, kv_spec, kv_spec],
            out_specs=ktv_out_spec,
            scratch_shapes=[pltpu.VMEM((D, D), jnp.float32)]),
        compiler_params=pltpu.CompilerParams(
            dimension_semantics=("parallel", "parallel", "arbitrary"),
            vmem_limit_bytes=vmem_limit),
        cost_estimate=pl.CostEstimate(
            flops=2 * B * H * Skv * D * D,
            transcendentals=B * H * Skv * D,
            bytes_accessed=(2 * B * H * Skv * D * itemsize
                            + B * Skv * 4 + B * H * D * D * 4)),
    )(mask_col, K, V)

    # ---------------- Stage 2: X[b, h] = phi(Q) @ ktv[b, h] -------------------
    tq = _choose_tile(Sq)
    n_q = Sq // tq

    q_spec = pl.BlockSpec((None, None, tq, D), lambda b, h, s: (b, h, s, 0))
    ktv_in_spec = pl.BlockSpec((None, None, D, D), lambda b, h, s: (b, h, 0, 0))
    o_spec = pl.BlockSpec((None, None, tq, D), lambda b, h, s: (b, h, s, 0))

    out = pl.pallas_call(
        functools.partial(_out_kernel, dot_dtype=dot_dtype),
        out_shape=jax.ShapeDtypeStruct((B, H, Sq, D), Q.dtype),
        grid_spec=pltpu.PrefetchScalarGridSpec(
            num_scalar_prefetch=0,
            grid=(B, H, n_q),
            in_specs=[q_spec, ktv_in_spec],
            out_specs=o_spec),
        compiler_params=pltpu.CompilerParams(
            dimension_semantics=("parallel", "parallel", "parallel"),
            vmem_limit_bytes=vmem_limit),
        cost_estimate=pl.CostEstimate(
            flops=2 * B * H * Sq * D * D,
            transcendentals=B * H * Sq * D,
            bytes_accessed=(2 * B * H * Sq * D * itemsize
                            + B * H * D * D * 4)),
    )(Q, ktv)
    return out

    # TODO(synk): a lane-dense (B, S, H*D) output slab (for D < 128) would need
    # a physical transpose of the (B, H, S, D) I/O; left in head-major layout.


def linear_attention_ref(Q, K, V, mask):
    # Pure-JAX reference mirroring the PyTorch forward exactly.
    Qf = (jax.nn.elu(Q) + 1.0) / math.sqrt(math.sqrt(Q.shape[2]))
    Kf = (jax.nn.elu(K) + 1.0) * mask[:, None, :, None] / math.sqrt(
        math.sqrt(K.shape[2]))
    Vf = V * mask[:, None, :, None]
    return jnp.matmul(Qf, jnp.matmul(jnp.swapaxes(Kf, -2, -1), Vf))


if __name__ == "__main__":
    key = jax.random.PRNGKey(0)
    kq, kk, kv, km = jax.random.split(key, 4)

    B, H, S, D = 2, 4, 16, 32
    Q = jax.random.normal(kq, (B, H, S, D), dtype=jnp.float32)
    K = jax.random.normal(kk, (B, H, S, D), dtype=jnp.float32)
    V = jax.random.normal(kv, (B, H, S, D), dtype=jnp.float32)
    mask = (jax.random.uniform(km, (B, S)) > 0.3).astype(jnp.float32)

    out = linear_attention(Q, K, V, mask)
    jax.block_until_ready(out)

    ref = linear_attention_ref(Q, K, V, mask)
    max_err = float(jnp.max(jnp.abs(out - ref)))
    assert jnp.allclose(out, ref, atol=1e-4, rtol=1e-4), max_err

    print("KERNEL_OK")
</pallas_src>

<mosaic_0001>
module attributes {stable_mosaic.version = 11 : i64} {
  func.func @_ktv_kernel(%arg0: i32, %arg1: i32, %arg2: i32, %arg3: memref<1x16x1xf32, #tpu.memory_space<vmem>>, %arg4: memref<1x1x16x32xf32, #tpu.memory_space<vmem>>, %arg5: memref<1x1x16x32xf32, #tpu.memory_space<vmem>>, %arg6: memref<1x1x32x32xf32, #tpu.memory_space<vmem>>, %arg7: memref<32x32xf32, #tpu.memory_space<vmem>>) attributes {dimension_semantics = [#tpu.dimension_semantics<parallel>, #tpu.dimension_semantics<parallel>, #tpu.dimension_semantics<arbitrary>], iteration_bounds = array<i64: 2, 4, 1>, scalar_prefetch = 0 : i64, scratch_operands = 1 : i64, tpu.core_type = #tpu.core_type<tc>, window_params = [{transform_indices = @transform_0, window_bounds = array<i64: 1, 16, 1>}, {transform_indices = @transform_1, window_bounds = array<i64: 1, 1, 16, 32>}, {transform_indices = @transform_2, window_bounds = array<i64: 1, 1, 16, 32>}, {transform_indices = @transform_3, window_bounds = array<i64: 1, 1, 32, 32>}]} {
    %c0_i32 = arith.constant 0 : i32
    %0 = arith.cmpi eq, %arg2, %c0_i32 : i32
    %1 = arith.extui %0 : i1 to i32
    %c0_i32_0 = arith.constant 0 : i32
    %2 = arith.cmpi ne, %1, %c0_i32_0 : i32
    scf.if %2 {
      %cst_19 = arith.constant 0.000000e+00 : f32
      %25 = vector.broadcast %cst_19 : f32 to vector<32x32xf32>
      %c0_20 = arith.constant 0 : index
      %c0_21 = arith.constant 0 : index
      %26 = vector.load %arg7[%c0_20, %c0_21] : memref<32x32xf32, #tpu.memory_space<vmem>>, vector<32x32xf32>
      tpu.vector_store %arg7[%c0_20, %c0_21], %25 {strides = array<i32>} : memref<32x32xf32, #tpu.memory_space<vmem>>, vector<32x32xf32>,
    } else {
    }
    %c0 = arith.constant 0 : index
    %c0_1 = arith.constant 0 : index
    %c0_2 = arith.constant 0 : index
    %c0_3 = arith.constant 0 : index
    %3 = vector.load %arg4[%c0, %c0_1, %c0_2, %c0_3] : memref<1x1x16x32xf32, #tpu.memory_space<vmem>>, vector<1x1x16x32xf32>
    %4 = vector.shape_cast %3 : vector<1x1x16x32xf32> to vector<16x32xf32>
    %c0_4 = arith.constant 0 : index
    %c0_5 = arith.constant 0 : index
    %c0_6 = arith.constant 0 : index
    %5 = vector.load %arg3[%c0_4, %c0_5, %c0_6] : memref<1x16x1xf32, #tpu.memory_space<vmem>>, vector<1x16x1xf32>
    %6 = vector.shape_cast %5 : vector<1x16x1xf32> to vector<16x1xf32>
    %cst = arith.constant 0.000000e+00 : f32
    %7 = vector.broadcast %cst : f32 to vector<16x32xf32>
    %8 = arith.cmpf ogt, %4, %7 : vector<16x32xf32>
    %cst_7 = arith.constant 1.000000e+00 : f32
    %9 = vector.broadcast %cst_7 : f32 to vector<16x32xf32>
    %10 = arith.addf %4, %9 : vector<16x32xf32>
    %11 = math.exp %4 : vector<16x32xf32>
    %12 = arith.select %8, %10, %11 : vector<16x32xi1>, vector<16x32xf32>
    %13 = arith.mulf %6, %6 : vector<16x1xf32>
    %14 = vector.broadcast %13 : vector<16x1xf32> to vector<16x32xf32>
    %15 = arith.mulf %12, %14 : vector<16x32xf32>
    %c0_8 = arith.constant 0 : index
    %c0_9 = arith.constant 0 : index
    %c0_10 = arith.constant 0 : index
    %c0_11 = arith.constant 0 : index
    %16 = vector.load %arg5[%c0_8, %c0_9, %c0_10, %c0_11] : memref<1x1x16x32xf32, #tpu.memory_space<vmem>>, vector<1x1x16x32xf32>
    %17 = vector.shape_cast %16 : vector<1x1x16x32xf32> to vector<16x32xf32>
    %c0_12 = arith.constant 0 : index
    %c0_13 = arith.constant 0 : index
    %18 = vector.load %arg7[%c0_12, %c0_13] : memref<32x32xf32, #tpu.memory_space<vmem>>, vector<32x32xf32>
    %cst_14 = arith.constant dense<0.000000e+00> : vector<32x32xf32>
    %19 = tpu.matmul %15, %17, %cst_14 {dimension_numbers = #tpu.dot_dimension_numbers<[0], [0], [1], [1], [0, 1, 1, 1], [], []>} : vector<16x32xf32>, vector<16x32xf32>, vector<32x32xf32> -> vector<32x32xf32>
    %20 = arith.addf %18, %19 : vector<32x32xf32>
    %c0_15 = arith.constant 0 : index
    %c0_16 = arith.constant 0 : index
    %21 = vector.load %arg7[%c0_15, %c0_16] : memref<32x32xf32, #tpu.memory_space<vmem>>, vector<32x32xf32>
    tpu.vector_store %arg7[%c0_15, %c0_16], %20 {strides = array<i32>} : memref<32x32xf32, #tpu.memory_space<vmem>>, vector<32x32xf32>,
    %c0_i32_17 = arith.constant 0 : i32
    %22 = arith.cmpi eq, %arg2, %c0_i32_17 : i32
    %23 = arith.extui %22 : i1 to i32
    %c0_i32_18 = arith.constant 0 : i32
    %24 = arith.cmpi ne, %23, %c0_i32_18 : i32
    scf.if %24 {
      %c0_19 = arith.constant 0 : index
      %c0_20 = arith.constant 0 : index
      %25 = vector.load %arg7[%c0_19, %c0_20] : memref<32x32xf32, #tpu.memory_space<vmem>>, vector<32x32xf32>
      %cst_21 = arith.constant 2.500000e-01 : f32
      %26 = vector.broadcast %cst_21 : f32 to vector<32x32xf32>
      %27 = arith.mulf %25, %26 : vector<32x32xf32>
      %c0_22 = arith.constant 0 : index
      %c0_23 = arith.constant 0 : index
      %c0_24 = arith.constant 0 : index
      %c0_25 = arith.constant 0 : index
      %28 = vector.load %arg6[%c0_22, %c0_23, %c0_24, %c0_25] : memref<1x1x32x32xf32, #tpu.memory_space<vmem>>, vector<1x1x32x32xf32>
      %29 = vector.shape_cast %28 : vector<1x1x32x32xf32> to vector<32x32xf32>
      %30 = vector.shape_cast %27 : vector<32x32xf32> to vector<1x1x32x32xf32>
      tpu.vector_store %arg6[%c0_22, %c0_23, %c0_24, %c0_25], %30 {strides = array<i32>} : memref<1x1x32x32xf32, #tpu.memory_space<vmem>>, vector<1x1x32x32xf32>,
    } else {
    }
    return
  }
  func.func @transform_0(%arg0: i32, %arg1: i32, %arg2: i32) -> (i32, i32, i32) {
    %c0_i32 = arith.constant 0 : i32
    %c0_i32_0 = arith.constant 0 : i32
    return %arg0, %arg2, %c0_i32 : i32, i32, i32
  }
  func.func @transform_1(%arg0: i32, %arg1: i32, %arg2: i32) -> (i32, i32, i32, i32) {
    %c0_i32 = arith.constant 0 : i32
    %c0_i32_0 = arith.constant 0 : i32
    return %arg0, %arg1, %arg2, %c0_i32 : i32, i32, i32, i32
  }
  func.func @transform_2(%arg0: i32, %arg1: i32, %arg2: i32) -> (i32, i32, i32, i32) {
    %c0_i32 = arith.constant 0 : i32
    %c0_i32_0 = arith.constant 0 : i32
    return %arg0, %arg1, %arg2, %c0_i32 : i32, i32, i32, i32
  }
  func.func @transform_3(%arg0: i32, %arg1: i32, %arg2: i32) -> (i32, i32, i32, i32) {
    %c0_i32 = arith.constant 0 : i32
    %c0_i32_0 = arith.constant 0 : i32
    %c0_i32_1 = arith.constant 0 : i32
    return %arg0, %arg1, %c0_i32, %c0_i32_0 : i32, i32, i32, i32
  }
}

</mosaic_0001>

<bundles_post_ra>
// kernel: tpu_custom_call.1
= control target key start
LH: loop header
LB: loop body
LE: loop exit
PB: predicated region body
PF: predicated region fallthrough
CT: control target
= control target key end

     0   :  { %s1277_s0 = inlined_call_operand.vmem [shape: f32[2,16,1], index: 0, kind: input, shape index: {}]   ;;  %s1278_s1 = inlined_call_operand.hbm [shape: f32[2,4,16,32], index: 1, kind: input, shape index: {}]   ;;  %s1279_s2 = inlined_call_operand.hbm [shape: f32[2,4,16,32], index: 2, kind: input, shape index: {}]   ;;  %s1280_s3 = inlined_call_operand.hbm [shape: f32[2,4,32,32], index: 3, kind: output, shape index: {}]  }
   0x1   :  { %1287 = sst [smem:[#allocation14_spill]] %s1278_s1 }
   0x2   :  { %8 = vsyncpa [#allocation4], 0 }
   0x3   :  { %10 = vsyncpa [#allocation4 + $0x1], 0 }
   0x4   :  { %11 = vsyncpa [#allocation7], 0 }
   0x5   :  { %13 = vsyncpa [#allocation7 + $0x1], 0 }
   0x6   :  { %14 = vsyncpa [#allocation5], 0 }
   0x7   :  { %16 = vsyncpa [#allocation5 + $0x1], 0  ;;  %s996_s12 = smov 0   ;;  %s998_s13 = smov 0  }
   0x8   :  { %s1000_s14 = smov 0   ;;  %s1002_s15 = smov 0  }
   0x9   :  { %s1004_s16 = smov 0   ;;  %s1006_s17 = smov 0  }
   0xa   :  { %s1008_s18 = smov 0   ;;  %s1010_s19 = smov 0  }
   0xb LB: > { %s658_s20 = sadd.s32 4294967295, %s965_s19   ;;  %s659_s21 = sadd.s32 4294967294, %s965_s19   ;;  %s965_s19 = sphi %s1010_s19, %s22_s19   ;;  %s961_s18 = sphi %s1008_s18, %s1310_s18   ;;  %s957_s17 = sphi %s1006_s17, %s1309_s17   ;;  %s953_s16 = sphi %s1004_s16, %s1308_s16   ;;  %s949_s15 = sphi %s1002_s15, %s1307_s15   ;;  %s945_s14 = sphi %s1000_s14, %s1306_s14   ;;  %s941_s13 = sphi %s998_s13, %s1305_s13   ;;  %s937_s12 = sphi %s996_s12, %s1304_s12  }
   0xc   : > { %s37_s22 = sadd.s32 1, %s957_s17  ;;  %s41_s23 = sadd.s32 1, %s961_s18 }
   0xd   : > { %p39_p0 = scmp.ge.s32.totalorder %s37_s22, 4  ;;  %s80_s24 = sadd.s32 1, %s945_s14 }
   0xe   : > { %p87_p1 = scmp.ne.s32.totalorder %s945_s14, %s941_s13  ;;  %p88_p2 = scmp.eq.s32.totalorder %s965_s19, 0 }
   0xf   : > { %s1312_s22 = smov (%p39_p0, %s37_s22), 0  ;;  %s1314_s23 = smov (!%p39_p0, %s41_s23), %s961_s18 }
  0x10   : > { %1288 = sst [smem:[#allocation12_spill]] %s1312_s22  ;;  %s74_s25 = ssub.s32 %s957_s17, %s1312_s22 }
  0x11   : > { %p1049_p3 = por %p88_p2, %p87_p1  ;;  %p43_p4 = scmp.ge.s32.totalorder %s1314_s23, 2 }
  0x12   : > { %p93_p5 = scmp.ne.s32.totalorder %s941_s13, %s937_s12  ;;  %p94_p6 = scmp.eq.s32.totalorder %s658_s20, 0 }
  0x13   : > { %p149_p7 = scmp.eq.s32.totalorder %s658_s20, 7  ;;  %s1316_s23 = smov (%p43_p4, %s1314_s23), 0 }
  0x14   : > { %1290 = sst [smem:[#allocation13_spill]] %s1316_s23  ;;  %p1057_p8 = por %p94_p6, %p93_p5 }
  0x15   : > { %p1061_p9 = por %p149_p7, %p87_p1  ;;  %s73_s29 = ssub.s32 %s961_s18, %s1316_s23 }
  0x16   : > { %s1291_s27 = scalar_select %p1057_p8, 1, 0 }
  0x17   : > { %s1292_s28 = scalar_select %p1061_p9, 1, 0 }
  0x18   : > { %p155_p10 = scmp.eq.s32.totalorder %s659_s21, 7  ;;  %s75_s30 = sor.u32 %s74_s25, %s73_s29 }
  0x19   : > { %p78_p11 = scmp.eq.s32.totalorder %s75_s30, 0  ;;  %p726_p13 = scmp.lt.s32.totalorder %s965_s19, 8 }
  0x1a   : > { %p1067_p12 = por %p155_p10, %p93_p5  ;;  %s1073_s5 = sand.u32 1, %s945_s14  }
  0x1b   : > { %s1076_s6 = scalar_select %p78_p11, %s945_s14, %s80_s24  }
  0x1c   : > { %s1293_s4 = scalar_select %p1067_p12, 1, 0 }
  0x1d   : > { %s1281_s7 = sshll.u32 %s1073_s5, 4  ;;  %s663_s8 = sshll.u32 %s957_s17, 1 }
  0x1e   : > { %s664_s9 = sshll.u32 %s961_s18, 3  ;;  %s192_s10 = scalar_lea.vmem [#allocation3], %s1281_s7 }
  0x1f   : > { %s203_s11 = sshll.u32 %s192_s10, 4  ;;  %s1083_s20 = sadd.s32 %s664_s9, %s663_s8  ;;  %s1085_s11 = int_to_ptr.vmem [resolvable:$true] %s203_s11 }
  0x20   : > { %s1282_s21 = sshll.u32 %s1083_s20, 7  ;;  %p1090_p0 = pnand %p726_p13, %p1049_p3 }
  0x21   : > { %s1295_s1 = sld [smem:[#allocation14_spill]]  ;;  %s189_s8 = scalar_lea.sflag [#allocation4], %s1073_s5 }
  0x22   : > { %p805_p2 = pneg %p1090_p0 }
  0x27   : > { %s1099_s30 = scalar_lea.hbm %s1295_s1, %s1282_s21  ;;  %s808_s24 = scalar_lea.hbm %s1295_s1, 2048 }
  0x28   : > { %s803_s9 = scalar_lea.hbm %s1099_s30, 256  ;;  %p809_p5 = scmp.lt.u32.totalorder %s1099_s30, %s1295_s1 }
  0x29   : > { %p804_p1 = scmp.ne.s32.totalorder %s1099_s30, %s803_s9  ;;  %p810_p6 = scmp.lt.u32.totalorder %s808_s24, %s803_s9 }
  0x2a   : > { %p812_p10 = scmp.lt.u32.totalorder %s803_s9, %s1099_s30 }
  0x2b   : > { %p806_p3 = pnand %p805_p2, %p804_p1  ;;  %p811_p7 = por %p810_p6, %p809_p5 }
  0x2d   : > { %p807_p4 = pneg %p806_p3  ;;  %p813_p11 = por %p812_p10, %p811_p7 }
  0x2f   : > { %p814_p13 = pnand %p813_p11, %p807_p4 }
  0x31   : > { %817 = shalt.err (!%p814_p13)
}
  0x32   : > { %s818_s21 = scalar_lea.vmem %s1085_s11, 256  ;;  %s967_s26 = smov [#allocation3]  }
  0x33   : > { %p819_p1 = scmp.ne.s32.totalorder %s1085_s11, %s818_s21  ;;  %s823_s10 = sshll.u32 %s967_s26, 4  ;;  %s824_s10 = int_to_ptr.vmem [resolvable:$false] %s823_s10 }
  0x34   : > { %s825_s7 = scalar_lea.vmem %s824_s10, 512  ;;  %p826_p9 = scmp.lt.s32.totalorder %s1085_s11, %s824_s10 }
  0x35   : > { %p821_p3 = pnand %p819_p1, %p805_p2  ;;  %p827_p5 = scmp.lt.s32.totalorder %s825_s7, %s818_s21 }
  0x37   : > { %p822_p12 = pneg %p821_p3  ;;  %p828_p6 = por %p827_p5, %p826_p9 }
  0x39   : > { %p829_p7 = pnand %p828_p6, %p822_p12 }
  0x3b   : > { %832 = shalt.err (!%p829_p7)
}
  0x3c   : > { %s968_s9 = smov 128   ;;  %s969_s24 = smov 8  }
  0x3d   : > { %718 = dma.hbm_to_vmem [thread:$0]  (!%p1090_p0), %s1099_s30, 256, %s1085_s11, %s189_s8, %s968_s9, %s968_s9, %s969_s24  }
  0x3e   : > { %p670_p9 = scmp.ge.s32.totalorder %s965_s19, 1  ;;  %p236_p12 = scmp.lt.s32.totalorder %s965_s19, 9 }
  0x3f   : > { %s1297_s29 = sshll.u32 %s1083_s20, 7  ;;  %s1298_s1 = sshll.u32 %s1073_s5, 4 }
  0x40   : > { %p1134_p4 = pnand %p670_p9, %p236_p12  ;;  %s1143_s7 = scalar_lea.hbm %s1279_s2, %s1297_s29 }
  0x41   : > { %s217_s23 = scalar_lea.vmem [#allocation6], %s1298_s1  ;;  %s214_s11 = scalar_lea.sflag [#allocation7], %s1073_s5 }
  0x42   : > { %s228_s22 = sshll.u32 %s217_s23, 4  ;;  %s833_s30 = scalar_lea.hbm %s1143_s7, 256  ;;  %s1147_s22 = int_to_ptr.vmem [resolvable:$true] %s228_s22 }
  0x43   : > { %p834_p10 = scmp.ne.s32.totalorder %s1143_s7, %s833_s30  ;;  %s838_s29 = scalar_lea.hbm %s1279_s2, 2048 }
  0x44   : > { %p839_p1 = scmp.lt.u32.totalorder %s1143_s7, %s1279_s2  ;;  %p840_p3 = scmp.lt.u32.totalorder %s838_s29, %s833_s30 }
  0x45   : > { %p836_p11 = pnand %p834_p10, %p805_p2  ;;  %p842_p6 = scmp.lt.u32.totalorder %s833_s30, %s1143_s7 }
  0x46   : > { %p841_p5 = por %p840_p3, %p839_p1 }
  0x47   : > { %p837_p13 = pneg %p836_p11 }
  0x48   : > { %p843_p7 = por %p842_p6, %p841_p5 }
  0x4a   : > { %p844_p9 = pnand %p843_p7, %p837_p13 }
  0x4c   : > { %847 = shalt.err (!%p844_p9)
}
  0x4d   : > { %s848_s1 = scalar_lea.vmem %s1147_s22, 256  ;;  %s970_s23 = smov [#allocation6]  }
  0x4e   : > { %p849_p12 = scmp.ne.s32.totalorder %s1147_s22, %s848_s1  ;;  %s853_s20 = sshll.u32 %s970_s23, 4  ;;  %s854_s20 = int_to_ptr.vmem [resolvable:$false] %s853_s20 }
  0x4f   : > { %s855_s8 = scalar_lea.vmem %s854_s20, 512  ;;  %p856_p8 = scmp.lt.s32.totalorder %s1147_s22, %s854_s20 }
  0x50   : > { %p851_p10 = pnand %p849_p12, %p805_p2  ;;  %p857_p1 = scmp.lt.s32.totalorder %s855_s8, %s848_s1 }
  0x52   : > { %p852_p11 = pneg %p851_p10  ;;  %p858_p3 = por %p857_p1, %p856_p8 }
  0x54   : > { %p859_p5 = pnand %p858_p3, %p852_p11 }
  0x56   : > { %862 = shalt.err (!%p859_p5)
}
  0x57   : > { %721 = dma.hbm_to_vmem [thread:$0]  (!%p1090_p0), %s1143_s7, 256, %s1147_s22, %s214_s11, %s968_s9, %s968_s9, %s969_s24  }
  0x58   : > { %240 = sbr.rel (%p1134_p4) target bundleno = 618 (0x26a), region = 32  ;;  %s1181_s30 = sand.u32 (!%p1134_p4), 1, %s941_s13  }
  0x59   : > { %s671_s29 = sshll.u32 (!%p1134_p4), %s1181_s30, 4  ;;  %s243_s26 = scalar_lea.sflag (!%p1134_p4), [#allocation4], %s1181_s30 }
  0x5a   : > { %s246_s25 = scalar_lea.vmem (!%p1134_p4), [#allocation3], %s671_s29  ;;  %p1299_p8 = scmp.ne.s32.totalorder (!%p1134_p4), %s1291_s27, 0 }
  0x5f   : > { %924 = dma.done.wait (%p1299_p8), %s243_s26, 256  }
  0x60   : > { %926 = vsyncadd (%p1299_p8), %s243_s26, 4294967040  ;;  %s252_s22 = scalar_lea.sflag [#allocation7], %s1181_s30  ;;  %s1190_s5 = scalar_lea.vmem [#allocation6], %s671_s29 }
  0x61   : > { %928 = dma.done.wait (%p1299_p8), %s252_s22, 256  }
  0x62   : > { %930 = vsyncadd (%p1299_p8), %s252_s22, 4294967040  ;;  %p293_p0 = scmp.lt.s32.totalorder %s953_s16, 1  ;;  %v971_v0 = vmov 0   ;;  %v313_v5 = vld [vmem:[%s246_s25] sm:$0xff]  ;;  %v314_v7 = vld [vmem:[%s246_s25 + $0x8] sm:$0xff]  ;;  %vm308_vm2 = vcmask 261120  }
  0x63   : > { %798 = vset.pattern.permute.xlu0 %v971_v0  ;;  %v321_v6 = vmul.f32 1.442695, %v313_v5  ;;  %v323_v8 = vmul.f32 1.442695, %v314_v7  ;;  %v319_v9 = vadd.f32 1.0, %v313_v5  ;;  %vm317_vm0 = vcmp.gt.f32.partialorder %v313_v5, 0.0 }
  0x64   : > { %s294_s9 = scalar_select %p293_p0, %s953_s16, 1  ;;  %v320_v12 = vadd.f32 1.0, %v314_v7  ;;  %vm318_vm1 = vcmp.gt.f32.partialorder %v314_v7, 0.0  ;;  %v341_v16 = vld [vmem:[%s1190_s5] sm:$0xff]  ;;  %v342_v17 = vld [vmem:[%s1190_s5 + $0x8] sm:$0xff]  ;;  %v972_v22 = vmov 0.0  }
  0x65   : > { %799 = vpow2.f32 %v321_v6  ;;  %v703_v19 = vpack.c.bf16 %v342_v17, %v341_v16  ;;  %310 = vst.msk [vmem:[#allocation2 + $0x8] sm:$0xff] %vm308_vm2, %v972_v22  ;;  %309 = vst.msk [vmem:[#allocation2] sm:$0xff] %vm308_vm2, %v972_v22  ;;  %vm379_vm3 = vcmask 130048   ;;  %s673_s27 = sshll.u32 %s1181_s30, 5  ;;  %s681_s10 = sshll.u32 %s949_s15, 2 }
  0x66   : > { %s686_s24 = sshll.u32 %s294_s9, 4  ;;  %801 = vpow2.f32 %v323_v8  ;;  %311 = vst.msk [vmem:[#allocation2 + $0x10] sm:$0xff] %vm308_vm2, %v972_v22  ;;  %312 = vst.msk [vmem:[#allocation2 + $0x18] sm:$0xff] %vm308_vm2, %v972_v22  ;;  %s682_s1 = sshll.u32 %s953_s16, 4 }
  0x67   : > { %s300_s11 = scalar_lea.vmem %s1277_s0, %s686_s24  ;;  %704 = vmatprep.subr.bf16.mxu0 %v703_v19  ;;  %707 = vmatprep.subr.bf16.mxu1 %v703_v19  ;;  %s291_s23 = scalar_lea.vmem [#allocation8], %s673_s27 }
  0x68   : > { %v315_v1 = vld [vmem:[%s300_s11] sm:$0xff]  ;;  %v316_v2 = vld [vmem:[%s300_s11 + $0x8] sm:$0xff]  ;;  %706 = vmatpush3.bf16.msra.mxu0 %v703_v19  ;;  %708 = vmatpush3.bf16.msra.mxu1 %v703_v19  ;;  %s514_s20 = sadd.s32 %s682_s1, %s681_s10  ;;  %s517_s29 = sshll.u32 %s291_s23, 4  ;;  %s1221_s29 = int_to_ptr.vmem [resolvable:$true] %s517_s29 }
  0x69   : > { %v327_v3 = vmul.f32 %v315_v1, %v315_v1  ;;  %v328_v4 = vmul.f32 %v316_v2, %v316_v2  ;;  %s683_s8 = sshll.u32 %s514_s20, 7  ;;  %s502_s25 = scalar_lea.sflag [#allocation5], %s1181_s30 }
  0x6a   : > { %s1219_s26 = scalar_lea.hbm %s1280_s3, %s683_s8  ;;  %s863_s22 = scalar_lea.vmem %s1221_s29, 512 }
  0x6b   : > { %331 = vperm.xlu0 %798, %v327_v3   ;;  %p864_p2 = scmp.ne.s32.totalorder %s1221_s29, %s863_s22  ;;  %p1300_p4 = scmp.ne.s32.totalorder %s1292_s28, 0 }
  0x6c   : > { %v344_v27 = vld [vmem:[#allocation2 + $0x8] sm:$0xff]  ;;  %v343_v28 = vld [vmem:[#allocation2] sm:$0xff]  ;;  %s973_s5 = smov [#allocation8]  }
  0x6d   : > { %v346_v33 = vld [vmem:[#allocation2 + $0x18] sm:$0xff]  ;;  %v345_v34 = vld [vmem:[#allocation2 + $0x10] sm:$0xff]  ;;  %p865_p13 = pnand %p864_p2, %p1300_p4  ;;  %s867_s9 = sshll.u32 %s973_s5, 4  ;;  %s868_s9 = int_to_ptr.vmem [resolvable:$false] %s867_s9 }
  0x6e   : > { %s869_s24 = scalar_lea.vmem %s868_s9, 1024  ;;  %p870_p7 = scmp.lt.s32.totalorder %s1221_s29, %s868_s9 }
  0x6f   : > { %336 = vperm.xlu0 %798, %v328_v4   ;;  %v800_v10 = vpop.eup %799  ;;  %p866_p6 = pneg %p865_p13  ;;  %p871_p9 = scmp.lt.s32.totalorder %s869_s24, %s863_s22 }
  0x70   : > { %v325_v11 = vsel %vm317_vm0, %v319_v9, %v800_v10  ;;  %v802_v13 = vpop.eup %801 }
  0x71   : > { %v326_v18 = vsel %vm318_vm1, %v320_v12, %v802_v13  ;;  %p872_p12 = por %p871_p9, %p870_p7 }
  0x73   : > { %p873_p10 = pnand %p872_p12, %p866_p6 }
  0xea   : > { %v332_v14 = vpop.permute.xlu0 %331 }
  0xeb   : > { %v339_v15 = vmul.f32 %v332_v14, %v325_v11 }
  0xed   : > { %347 = vxpose.xlu1.b32.start [1/2] (short) (narrow) %v339_v15, 32 }
  0xee   : > { %v337_v20 = vpop.permute.xlu0 %336 }
  0xef   : > { %v340_v21 = vmul.f32 %v337_v20, %v326_v18 }
  0xf1   : > { %348 = vxpose.xlu1.b32.end [2/2] (short) (narrow) %v340_v21, 32 }
 0x16d   : > { %v363_v23 = vpop.trf.xlu1 }
 0x16e   : > { %697 = vmatprep.mubr.msk.f32.mxu0 %vm379_vm3, %v363_v23 }
 0x171   : > { %v364_v24 = vpop.trf.xlu1 }
 0x172   : > { %698 = vmatmul.mubr.msk.f32.vlgmr.msra.gmra.mrb[0].mxu0 %vm379_vm3, %v364_v24 }
 0x175   : > { %v365_v25 = vpop.trf.xlu1 }
 0x176   : > { %700 = vmatprep.mubr.msk.f32.mxu1 %vm379_vm3, %v365_v25 }
 0x179   : > { %v366_v26 = vpop.trf.xlu1 }
 0x17a   : > { %701 = vmatmul.mubr.msk.f32.vlgmr.msra.gmra.mrb[0].mxu1 %vm379_vm3, %v366_v26 }
 0x245   : > { %v699_v29 = vpop.f32.mrb[0].mxu0 }
 0x246   : > { %v478_v30 = vadd.f32 %v699_v29, %v344_v27  ;;  %v458_v31 = vpop.f32.mrb[1].mxu0 }
 0x247   : > { %v477_v32 = vadd.f32 %v458_v31, %v343_v28 }
 0x248   : > { %483 = vst.msk [vmem:[#allocation2 + $0x8] sm:$0xff] %vm308_vm2, %v478_v30 }
 0x249   : > { %482 = vst.msk [vmem:[#allocation2] sm:$0xff] %vm308_vm2, %v477_v32 }
 0x24d   : > { %v702_v35 = vpop.f32.mrb[0].mxu1 }
 0x24e   : > { %v480_v36 = vadd.f32 %v702_v35, %v346_v33  ;;  %v468_v37 = vpop.f32.mrb[1].mxu1 }
 0x24f   : > { %v479_v38 = vadd.f32 %v468_v37, %v345_v34  ;;  %v490_v39 = vld [vmem:[#allocation2 + $0x8] sm:$0xff] }
 0x250   : > { %485 = vst.msk [vmem:[#allocation2 + $0x18] sm:$0xff] %vm308_vm2, %v480_v36  ;;  %v489_v40 = vld [vmem:[#allocation2] sm:$0xff]  ;;  %v494_v41 = vmul.f32 0.25, %v490_v39 }
 0x251   : > { %484 = vst.msk [vmem:[#allocation2 + $0x10] sm:$0xff] %vm308_vm2, %v479_v38  ;;  %v493_v42 = vmul.f32 0.25, %v489_v40 }
 0x252   : > { %498 = vst.msk [vmem:[%s291_s23 + $0x8] sm:$0xff] %vm308_vm2, %v494_v41 }
 0x253   : > { %497 = vst.msk [vmem:[%s291_s23] sm:$0xff] %vm308_vm2, %v493_v42 }
 0x257   : > { %v492_v43 = vld [vmem:[#allocation2 + $0x18] sm:$0xff] }
 0x258   : > { %v491_v44 = vld [vmem:[#allocation2 + $0x10] sm:$0xff]  ;;  %v496_v45 = vmul.f32 0.25, %v492_v43 }
 0x259   : > { %v495_v46 = vmul.f32 0.25, %v491_v44 }
 0x25a   : > { %500 = vst.msk [vmem:[%s291_s23 + $0x18] sm:$0xff] %vm308_vm2, %v496_v45 }
 0x25b   : > { %499 = vst.msk [vmem:[%s291_s23 + $0x10] sm:$0xff] %vm308_vm2, %v495_v46 }
 0x25c   : > { %876 = shalt.err (!%p873_p10)
}
 0x25d   : > { %s877_s21 = scalar_lea.hbm %s1219_s26, 512  ;;  %s881_s27 = scalar_lea.hbm %s1280_s3, 4096 }
 0x25e   : > { %p878_p11 = scmp.ne.s32.totalorder %s1219_s26, %s877_s21  ;;  %p882_p5 = scmp.lt.u32.totalorder %s1219_s26, %s1280_s3 }
 0x25f   : > { %p883_p8 = scmp.lt.u32.totalorder %s881_s27, %s877_s21  ;;  %p885_p2 = scmp.lt.u32.totalorder %s877_s21, %s1219_s26 }
 0x260   : > { %p879_p1 = pnand %p878_p11, %p1300_p4 }
 0x261   : > { %p884_p0 = por %p883_p8, %p882_p5 }
 0x262   : > { %p880_p3 = pneg %p879_p1 }
 0x263   : > { %p886_p13 = por %p885_p2, %p884_p0 }
 0x265   : > { %p887_p6 = pnand %p886_p13, %p880_p3 }
 0x267   : > { %890 = shalt.err (!%p887_p6)
}
 0x268   : > { %s974_s23 = smov 128   ;;  %s975_s20 = smov 8  }
 0x269   : > { %713 = dma.vmem_to_hbm [thread:$0]  (%p1300_p4), %s1221_s29, 512, %s1219_s26, %s502_s25, %s974_s23, %s974_s23, %s975_s20  }
 0x26a PF: > { %p727_p7 = scmp.ge.s32.totalorder %s965_s19, 2  ;;  %s532_s8 = sand.u32 1, %s937_s12  }
 0x26b   : > { %p1301_p9 = scmp.ne.s32.totalorder %s1293_s4, 0  ;;  %s533_s15 = scalar_lea.sflag [#allocation5], %s532_s8 }
 0x26d   : > { %p723_p12 = pnand %p727_p7, %p1301_p9 }
 0x26f   : > { %932 = dma.done.wait (!%p723_p12), %s533_s15, 512  }
 0x270   : > { %934 = vsyncadd (!%p723_p12), %s533_s15, 4294966784  ;;  %s22_s19 = sadd.s32 1, %s965_s19   ;;  %s1302_s28 = sld [smem:[#allocation12_spill]] }
 0x271   : > { %p19_p10 = scmp.ge.s32.totalorder %s22_s19, 10   ;;  %s1303_s30 = sld [smem:[#allocation13_spill]] }
 0x272   : > { %s1304_s12 = smov %s941_s13  ;;  %s1305_s13 = smov %s945_s14 }
 0x273   : > { %s1306_s14 = smov %s1076_s6  ;;  %s1307_s15 = smov %s957_s17 }
 0x274   : > { %s1308_s16 = smov %s961_s18  ;;  %21 = sbr.rel (!%p19_p10) target bundleno = 11 (0xb), region = 101 }
 0x276   : > { %s1309_s17 = smov %s1302_s28 }
 0x277   : > { %s1310_s18 = smov %s1303_s30 }
 0x27b   :  { %538 = vsyncpa [#allocation4], 1 }
 0x27c   :  { %540 = vsyncpa [#allocation4 + $0x1], 1 }
 0x27d   :  { %541 = vsyncpa [#allocation7], 1 }
 0x27e   :  { %543 = vsyncpa [#allocation7 + $0x1], 1 }
 0x27f   :  { %544 = vsyncpa [#allocation5], 1 }
 0x280   :  { %546 = vsyncpa [#allocation5 + $0x1], 1 }

</bundles_post_ra>
